<compile_context>
chip_gen: v6e
topology: v6e:2x2x1
jax: 0.10.0
libtpu: 0.0.40
codegen_flags: <defaults>
</compile_context>

<pallas_src>
import functools
import math

import jax
import jax.numpy as jnp
from jax.experimental import pallas as pl
from jax.experimental.pallas import tpu as pltpu


# ----------------------------- Pallas kernel --------------------------------
def _circ_conv1d_kernel(x_ref, w_ref, o_ref, *, compute_dtype):
    """Circular Conv1d (k=3, pad=1 circular, no bias) over the token axis.

    x_ref: (B_blk, N, Q)   un-padded token sequence block
    w_ref: (3, Q, D)       tap-major conv weight (resident across grid steps)
    o_ref: (B_blk, N, D)
    """
    b_blk, n, q = x_ref.shape
    # Fuse the batch into the matmul M dimension: one (B_blk*N, Q) LHS,
    # three MXU matmuls (one per tap) on fully aligned tiles.
    x = x_ref[...].astype(compute_dtype).reshape(b_blk * n, q)
    y0 = jnp.dot(x, w_ref[0].astype(compute_dtype),
                 preferred_element_type=jnp.float32)
    y1 = jnp.dot(x, w_ref[1].astype(compute_dtype),
                 preferred_element_type=jnp.float32)
    y2 = jnp.dot(x, w_ref[2].astype(compute_dtype),
                 preferred_element_type=jnp.float32)
    # Circular combine, per batch (the wrap must not cross batch boundaries):
    #   out[b, t] = Y0[b, t-1] + Y1[b, t] + Y2[b, t+1]   (token index mod N)
    # The rolls act on small (N, D) output tiles that are already in VMEM, so
    # the circular wrap costs no extra HBM traffic.
    for b in range(b_blk):                       # static unroll over batch
        lo = b * n                               # multiple of N -> aligned slice
        out_b = (jnp.roll(y0[lo:lo + n], 1, axis=0)        # Y0[t-1]
                 + y1[lo:lo + n]                            # Y1[t]
                 + jnp.roll(y2[lo:lo + n], n - 1, axis=0))  # Y2[t+1] (n-1 == -1 mod n)
        o_ref[b] = out_b.astype(o_ref.dtype)


def circular_conv1d_pallas(x_seq, weight, *, compute_dtype=jnp.float32,
                           num_batch_blocks=1):
    """x_seq: (B, N, Q); weight: (3, Q, D). Returns (B, N, D).

    num_batch_blocks: grid steps over the batch axis. 1 (single step) is best
    on v5e/v6e at these sizes; use 2 on v7x to feed both TensorCores.
    """
    B, N, Q = x_seq.shape
    K, Qw, D = weight.shape
    assert K == 3 and Qw == Q
    assert B % num_batch_blocks == 0, "num_batch_blocks must divide batch"
    b_blk = B // num_batch_blocks

    kernel = functools.partial(_circ_conv1d_kernel, compute_dtype=compute_dtype)
    return pl.pallas_call(
        kernel,
        out_shape=jax.ShapeDtypeStruct((B, N, D), x_seq.dtype),
        grid=(num_batch_blocks,),
        in_specs=[
            pl.BlockSpec((b_blk, N, Q), lambda i: (i, 0, 0)),
            pl.BlockSpec((K, Q, D), lambda i: (0, 0, 0)),   # weights resident
        ],
        out_specs=pl.BlockSpec((b_blk, N, D), lambda i: (i, 0, 0)),
        compiler_params=pltpu.CompilerParams(
            dimension_semantics=("parallel",)),
    )(x_seq, weight)


# ------------------------------ glue (JAX) -----------------------------------
def replication_pad2d(x, pad):
    left, right, top, bottom = pad
    return jnp.pad(x, ((0, 0), (0, 0), (top, bottom), (left, right)), mode="edge")


def unfold_to_tokens(x, patch_size, stride):
    """x: (B, C, H, W) already padded.

    Returns (B, L*C, P, P), matching
      nn.Unfold(P, stride)(x).transpose(1, 2).reshape(B, -1, P, P)
    i.e. token index n = (ph * nw + pw) * C + c.
    """
    B, C, H, W = x.shape
    P, s = patch_size, stride
    nh = (H - P) // s + 1
    nw = (W - P) // s + 1
    if s == P:
        # Non-overlapping patches: crop to the covered region and tile with a
        # single reshape + transpose (one cheap copy, no nh*nw slice ops).
        xc = x[:, :, :nh * P, :nw * P]
        patches = xc.reshape(B, C, nh, P, nw, P)
        patches = jnp.transpose(patches, (0, 2, 4, 1, 3, 5))  # (B,nh,nw,C,P,P)
        return patches.reshape(B, nh * nw * C, P, P)
    # General (overlapping stride) fallback.
    rows = []
    for ph in range(nh):
        cols = []
        for pw in range(nw):
            cols.append(x[:, :, ph * s:ph * s + P, pw * s:pw * s + P])
        rows.append(jnp.stack(cols, axis=2))          # (B, C, nw, P, P)
    patches = jnp.stack(rows, axis=2)                 # (B, C, nh, nw, P, P)
    patches = jnp.transpose(patches, (0, 2, 3, 1, 4, 5))
    return patches.reshape(B, nh * nw * C, P, P)


def init_token_conv_weight(key, d_model, patch_size):
    """Deterministic kaiming_normal_(mode='fan_in', nonlinearity='leaky_relu')."""
    q = patch_size * patch_size
    fan_in = q * 3
    neg_slope = 0.01
    gain = math.sqrt(2.0 / (1.0 + neg_slope ** 2))
    std = gain / math.sqrt(fan_in)
    # PyTorch Conv1d weight layout: (out_channels=d_model, in_channels=Q, k=3)
    return jax.random.normal(key, (d_model, q, 3), dtype=jnp.float32) * std


def patch_embedding_2d(x, conv_weight, patch_size, stride, *,
                       compute_dtype=jnp.float32, num_batch_blocks=1):
    """Forward pass of PatchEmbedding2D. Returns (embeddings, n_vars).

    x: (B, C, H, W) float32 (NCHW, as in PyTorch).
    conv_weight: (d_model, patch_size**2, 3) PyTorch Conv1d layout.
    """
    B, C, H, W = x.shape
    n_vars = C ** 2   # matches the PyTorch reference: n_vars = x.shape[1] ** 2
    xp = replication_pad2d(x, (stride, stride, stride, stride))
    tokens = unfold_to_tokens(xp, patch_size, stride)          # (B, N, P, P)
    N = tokens.shape[1]
    # TokenEmbedding: permute(0,2,3,1).reshape(B, P*P, N) makes the Conv1d
    # channel index q = i*P + j; in our (B, N, Q) layout that is a reshape.
    x_seq = tokens.reshape(B, N, patch_size * patch_size)      # (B, N, Q)
    w = jnp.transpose(conv_weight, (2, 1, 0))                  # (3, Q, D)
    out = circular_conv1d_pallas(x_seq, w, compute_dtype=compute_dtype,
                                 num_batch_blocks=num_batch_blocks)
    # TODO(synk): nn.Dropout is stochastic at train time; identity here (eval).
    return out, n_vars


def _reference(x_seq, conv_weight):
    """Pure-JAX reference of the circular Conv1d for validation."""
    xm1 = jnp.roll(x_seq, 1, axis=1)
    xp1 = jnp.roll(x_seq, -1, axis=1)
    return (jnp.einsum("bnq,dq->bnd", xm1, conv_weight[:, :, 0]) +
            jnp.einsum("bnq,dq->bnd", x_seq, conv_weight[:, :, 1]) +
            jnp.einsum("bnq,dq->bnd", xp1, conv_weight[:, :, 2]))


if __name__ == "__main__":
    key = jax.random.PRNGKey(0)
    kx, kw = jax.random.split(key)

    B, C, H, W = 2, 4, 16, 16
    d_model, patch_size, stride, dropout = 32, 4, 4, 0.1

    x = jax.random.normal(kx, (B, C, H, W), dtype=jnp.float32)
    conv_weight = init_token_conv_weight(kw, d_model, patch_size)

    out, n_vars = patch_embedding_2d(x, conv_weight, patch_size, stride)
    out = jax.block_until_ready(out)

    # sanity checks vs. pure-JAX reference of the same math
    xp = replication_pad2d(x, (stride, stride, stride, stride))
    tokens = unfold_to_tokens(xp, patch_size, stride)
    x_seq = tokens.reshape(B, tokens.shape[1], patch_size * patch_size)
    ref = _reference(x_seq, conv_weight)

    assert out.shape == (B, tokens.shape[1], d_model)
    assert n_vars == C ** 2
    assert jnp.allclose(out, ref, atol=1e-4, rtol=1e-4)

    print("KERNEL_OK")
</pallas_src>

<mosaic_0001>
module attributes {stable_mosaic.version = 11 : i64} {
  func.func @_circ_conv1d_kernel(%arg0: i32, %arg1: memref<2x144x16xf32, #tpu.memory_space<vmem>>, %arg2: memref<3x16x32xf32, #tpu.memory_space<vmem>>, %arg3: memref<2x144x32xf32, #tpu.memory_space<vmem>>) attributes {dimension_semantics = [#tpu.dimension_semantics<parallel>], iteration_bounds = array<i64: 1>, scalar_prefetch = 0 : i64, scratch_operands = 0 : i64, tpu.core_type = #tpu.core_type<tc>, window_params = [{transform_indices = @transform_0, window_bounds = array<i64: 2, 144, 16>}, {pipeline_mode = #tpu.pipeline_mode<synchronous>, transform_indices = @transform_1, window_bounds = array<i64: 3, 16, 32>}, {transform_indices = @transform_2, window_bounds = array<i64: 2, 144, 32>}]} {
    %c0 = arith.constant 0 : index
    %c0_0 = arith.constant 0 : index
    %c0_1 = arith.constant 0 : index
    %0 = vector.load %arg1[%c0, %c0_0, %c0_1] : memref<2x144x16xf32, #tpu.memory_space<vmem>>, vector<2x144x16xf32>
    %1 = vector.shape_cast %0 : vector<2x144x16xf32> to vector<288x16xf32>
    %c0_2 = arith.constant 0 : index
    %c0_3 = arith.constant 0 : index
    %c0_4 = arith.constant 0 : index
    %2 = vector.load %arg2[%c0_2, %c0_3, %c0_4] : memref<3x16x32xf32, #tpu.memory_space<vmem>>, vector<1x16x32xf32>
    %3 = vector.shape_cast %2 : vector<1x16x32xf32> to vector<16x32xf32>
    %cst = arith.constant dense<0.000000e+00> : vector<288x32xf32>
    %4 = tpu.matmul %1, %3, %cst {dimension_numbers = #tpu.dot_dimension_numbers<[1], [0], [0], [1], [0, 0, 1, 1], [], []>} : vector<288x16xf32>, vector<16x32xf32>, vector<288x32xf32> -> vector<288x32xf32>
    %c1 = arith.constant 1 : index
    %c0_5 = arith.constant 0 : index
    %c0_6 = arith.constant 0 : index
    %5 = vector.load %arg2[%c1, %c0_5, %c0_6] : memref<3x16x32xf32, #tpu.memory_space<vmem>>, vector<1x16x32xf32>
    %6 = vector.shape_cast %5 : vector<1x16x32xf32> to vector<16x32xf32>
    %cst_7 = arith.constant dense<0.000000e+00> : vector<288x32xf32>
    %7 = tpu.matmul %1, %6, %cst_7 {dimension_numbers = #tpu.dot_dimension_numbers<[1], [0], [0], [1], [0, 0, 1, 1], [], []>} : vector<288x16xf32>, vector<16x32xf32>, vector<288x32xf32> -> vector<288x32xf32>
    %c2 = arith.constant 2 : index
    %c0_8 = arith.constant 0 : index
    %c0_9 = arith.constant 0 : index
    %8 = vector.load %arg2[%c2, %c0_8, %c0_9] : memref<3x16x32xf32, #tpu.memory_space<vmem>>, vector<1x16x32xf32>
    %9 = vector.shape_cast %8 : vector<1x16x32xf32> to vector<16x32xf32>
    %cst_10 = arith.constant dense<0.000000e+00> : vector<288x32xf32>
    %10 = tpu.matmul %1, %9, %cst_10 {dimension_numbers = #tpu.dot_dimension_numbers<[1], [0], [0], [1], [0, 0, 1, 1], [], []>} : vector<288x16xf32>, vector<16x32xf32>, vector<288x32xf32> -> vector<288x32xf32>
    %11 = vector.extract_strided_slice %4 {offsets = [0, 0], sizes = [144, 32], strides = [1, 1]} : vector<288x32xf32> to vector<144x32xf32>
    %12 = vector.extract_strided_slice %11 {offsets = [143, 0], sizes = [1, 32], strides = [1, 1]} : vector<144x32xf32> to vector<1x32xf32>
    %13 = vector.extract_strided_slice %11 {offsets = [0, 0], sizes = [143, 32], strides = [1, 1]} : vector<144x32xf32> to vector<143x32xf32>
    %14 = tpu.concatenate %12, %13 in 0 : vector<1x32xf32>, vector<143x32xf32> -> vector<144x32xf32>
    %15 = vector.extract_strided_slice %7 {offsets = [0, 0], sizes = [144, 32], strides = [1, 1]} : vector<288x32xf32> to vector<144x32xf32>
    %16 = arith.addf %14, %15 : vector<144x32xf32>
    %17 = vector.extract_strided_slice %10 {offsets = [0, 0], sizes = [144, 32], strides = [1, 1]} : vector<288x32xf32> to vector<144x32xf32>
    %18 = vector.extract_strided_slice %17 {offsets = [1, 0], sizes = [143, 32], strides = [1, 1]} : vector<144x32xf32> to vector<143x32xf32>
    %19 = vector.extract_strided_slice %17 {offsets = [0, 0], sizes = [1, 32], strides = [1, 1]} : vector<144x32xf32> to vector<1x32xf32>
    %20 = tpu.concatenate %18, %19 in 0 : vector<143x32xf32>, vector<1x32xf32> -> vector<144x32xf32>
    %21 = arith.addf %16, %20 : vector<144x32xf32>
    %c0_11 = arith.constant 0 : index
    %c0_12 = arith.constant 0 : index
    %c0_13 = arith.constant 0 : index
    %22 = vector.load %arg3[%c0_11, %c0_12, %c0_13] : memref<2x144x32xf32, #tpu.memory_space<vmem>>, vector<1x144x32xf32>
    %23 = vector.shape_cast %22 : vector<1x144x32xf32> to vector<144x32xf32>
    %24 = vector.shape_cast %21 : vector<144x32xf32> to vector<1x144x32xf32>
    tpu.vector_store %arg3[%c0_11, %c0_12, %c0_13], %24 {strides = array<i32>} : memref<2x144x32xf32, #tpu.memory_space<vmem>>, vector<1x144x32xf32>,
    %25 = vector.extract_strided_slice %4 {offsets = [144, 0], sizes = [144, 32], strides = [1, 1]} : vector<288x32xf32> to vector<144x32xf32>
    %26 = vector.extract_strided_slice %25 {offsets = [143, 0], sizes = [1, 32], strides = [1, 1]} : vector<144x32xf32> to vector<1x32xf32>
    %27 = vector.extract_strided_slice %25 {offsets = [0, 0], sizes = [143, 32], strides = [1, 1]} : vector<144x32xf32> to vector<143x32xf32>
    %28 = tpu.concatenate %26, %27 in 0 : vector<1x32xf32>, vector<143x32xf32> -> vector<144x32xf32>
    %29 = vector.extract_strided_slice %7 {offsets = [144, 0], sizes = [144, 32], strides = [1, 1]} : vector<288x32xf32> to vector<144x32xf32>
    %30 = arith.addf %28, %29 : vector<144x32xf32>
    %31 = vector.extract_strided_slice %10 {offsets = [144, 0], sizes = [144, 32], strides = [1, 1]} : vector<288x32xf32> to vector<144x32xf32>
    %32 = vector.extract_strided_slice %31 {offsets = [1, 0], sizes = [143, 32], strides = [1, 1]} : vector<144x32xf32> to vector<143x32xf32>
    %33 = vector.extract_strided_slice %31 {offsets = [0, 0], sizes = [1, 32], strides = [1, 1]} : vector<144x32xf32> to vector<1x32xf32>
    %34 = tpu.concatenate %32, %33 in 0 : vector<143x32xf32>, vector<1x32xf32> -> vector<144x32xf32>
    %35 = arith.addf %30, %34 : vector<144x32xf32>
    %c1_14 = arith.constant 1 : index
    %c0_15 = arith.constant 0 : index
    %c0_16 = arith.constant 0 : index
    %36 = vector.load %arg3[%c1_14, %c0_15, %c0_16] : memref<2x144x32xf32, #tpu.memory_space<vmem>>, vector<1x144x32xf32>
    %37 = vector.shape_cast %36 : vector<1x144x32xf32> to vector<144x32xf32>
    %38 = vector.shape_cast %35 : vector<144x32xf32> to vector<1x144x32xf32>
    tpu.vector_store %arg3[%c1_14, %c0_15, %c0_16], %38 {strides = array<i32>} : memref<2x144x32xf32, #tpu.memory_space<vmem>>, vector<1x144x32xf32>,
    return
  }
  func.func @transform_0(%arg0: i32) -> (i32, i32, i32) {
    %c0_i32 = arith.constant 0 : i32
    %c0_i32_0 = arith.constant 0 : i32
    %c0_i32_1 = arith.constant 0 : i32
    return %arg0, %c0_i32, %c0_i32_0 : i32, i32, i32
  }
  func.func @transform_1(%arg0: i32) -> (i32, i32, i32) {
    %c0_i32 = arith.constant 0 : i32
    %c0_i32_0 = arith.constant 0 : i32
    %c0_i32_1 = arith.constant 0 : i32
    %c0_i32_2 = arith.constant 0 : i32
    return %c0_i32, %c0_i32_0, %c0_i32_1 : i32, i32, i32
  }
  func.func @transform_2(%arg0: i32) -> (i32, i32, i32) {
    %c0_i32 = arith.constant 0 : i32
    %c0_i32_0 = arith.constant 0 : i32
    %c0_i32_1 = arith.constant 0 : i32
    return %arg0, %c0_i32, %c0_i32_0 : i32, i32, i32
  }
}

</mosaic_0001>

<bundles_post_ra>
// kernel: tpu_custom_call.1
= control target key start
LH: loop header
LB: loop body
LE: loop exit
PB: predicated region body
PF: predicated region fallthrough
CT: control target
= control target key end

     0   :  { %vm49_vm0 = vcmask 130048   ;;  %vm919_vm1 = vcmask 1040384   ;;  %vm1009_vm2 = vcmask 1046528   ;;  %vm1083_vm3 = vcmask 261120   ;;  %s2456_s1 = inlined_call_operand.vmem [shape: f32[3,16,32], index: 1, kind: input, shape index: {}]   ;;  %s2457_s0 = inlined_call_operand.vmem [shape: f32[2,144,16], index: 0, kind: input, shape index: {}]   ;;  %s2458_s2 = inlined_call_operand.vmem [shape: f32[2,144,32], index: 2, kind: output, shape index: {}]  }
   0x1   :  { %v48_v0 = vld [vmem:[%s2456_s1 + $0x8] sm:$0xff]  ;;  %v47_v1 = vld [vmem:[%s2456_s1] sm:$0xff]  ;;  %v1758_v3 = vld [vmem:[%s2457_s0 + $0x90] sm:$0xff] }
   0x2   :  { %1551 = vmatprep.subr.mxu0 %v48_v0  ;;  %1725 = vmatprep.subr.mxu1 %v48_v0  ;;  %v1753_v2 = vld [vmem:[%s2457_s0] sm:$0xff]  ;;  %v1763_v4 = vld [vmem:[%s2457_s0 + $0x8] sm:$0xff]  ;;  %v1768_v5 = vld [vmem:[%s2457_s0 + $0x98] sm:$0xff] }
   0x3   :  { %1552 = vmatpush3.msra.mxu0 %v48_v0  ;;  %1727 = vmatpush3.msra.mxu1 %v48_v0  ;;  %v1382_v6 = vld [vmem:[%s2456_s1 + $0x28] sm:$0xff]  ;;  %v1344_v7 = vld [vmem:[%s2456_s1 + $0x18] sm:$0xff]  ;;  %v1787_v8 = vld [vmem:[%s2457_s0 + $0x10] sm:$0xff] }
   0x4   :  { %1553 = vmatprep.subr.mxu0 %v47_v1  ;;  %1726 = vmatprep.subr.mxu1 %v47_v1  ;;  %v1792_v9 = vld [vmem:[%s2457_s0 + $0xa0] sm:$0xff]  ;;  %v1797_v10 = vld [vmem:[%s2457_s0 + $0x18] sm:$0xff]  ;;  %v1802_v11 = vld [vmem:[%s2457_s0 + $0xa8] sm:$0xff] }
   0x5   :  { %1554 = vmatpush3.msra.mxu0 %v47_v1  ;;  %1728 = vmatpush3.msra.mxu1 %v47_v1  ;;  %v1807_v12 = vld [vmem:[%s2457_s0 + $0x20] sm:$0xff]  ;;  %v1812_v13 = vld [vmem:[%s2457_s0 + $0xb0] sm:$0xff]  ;;  %v1835_v16 = vld [vmem:[%s2457_s0 + $0x28] sm:$0xff] }
   0x6   :  { %1555 = vmatprep.mubr.msk.f32.mxu0 %vm49_vm0, %v1753_v2  ;;  %1582 = vmatprep.mubr.msk.f32.mxu1 %vm49_vm0, %v1758_v3  ;;  %v1381_v14 = vld [vmem:[%s2456_s1 + $0x20] sm:$0xff]  ;;  %v1343_v15 = vld [vmem:[%s2456_s1 + $0x10] sm:$0xff]  ;;  %v1840_v17 = vld [vmem:[%s2457_s0 + $0xb8] sm:$0xff] }
   0x7   :  { %1556 = vmatmul.mubr.msk.f32.vlgmr.msra.gmra.mxu0 %vm49_vm0, %v1763_v4  ;;  %1583 = vmatmul.mubr.msk.f32.vlgmr.msra.gmra.mxu1 %vm49_vm0, %v1768_v5  ;;  %v1845_v18 = vld [vmem:[%s2457_s0 + $0x30] sm:$0xff]  ;;  %v1850_v19 = vld [vmem:[%s2457_s0 + $0xc0] sm:$0xff]  ;;  %v18_v20 = vld [vmem:[%s2457_s0 + $0x38] sm:$0xff] }
   0x8   :  { %1667 = vmatprep.subr.mxu0 %v1382_v6  ;;  %1609 = vmatprep.subr.mxu1 %v1344_v7  ;;  %v1866_v21 = vld [vmem:[%s2457_s0 + $0xc8] sm:$0xff]  ;;  %v19_v22 = vld [vmem:[%s2457_s0 + $0x40] sm:$0xff]  ;;  %v1874_v23 = vld [vmem:[%s2457_s0 + $0xd0] sm:$0xff] }
   0x9   :  { %1668 = vmatpush3.msra.mxu0 %v1382_v6  ;;  %1610 = vmatpush3.msra.mxu1 %v1344_v7  ;;  %v20_v24 = vld [vmem:[%s2457_s0 + $0x48] sm:$0xff]  ;;  %v1888_v25 = vld [vmem:[%s2457_s0 + $0xd8] sm:$0xff]  ;;  %v21_v26 = vld [vmem:[%s2457_s0 + $0x50] sm:$0xff] }
   0xa   :  { %1558 = vmatprep.mubr.msk.f32.mxu0 %vm49_vm0, %v1787_v8  ;;  %1585 = vmatprep.mubr.msk.f32.mxu1 %vm49_vm0, %v1792_v9  ;;  %v1896_v27 = vld [vmem:[%s2457_s0 + $0xe0] sm:$0xff]  ;;  %v22_v28 = vld [vmem:[%s2457_s0 + $0x58] sm:$0xff]  ;;  %v1910_v29 = vld [vmem:[%s2457_s0 + $0xe8] sm:$0xff] }
   0xb   :  { %1559 = vmatmul.mubr.msk.f32.gmra.mxu0 %vm49_vm0, %v1797_v10  ;;  %1586 = vmatmul.mubr.msk.f32.gmra.mxu1 %vm49_vm0, %v1802_v11  ;;  %v23_v30 = vld [vmem:[%s2457_s0 + $0x60] sm:$0xff]  ;;  %v1918_v31 = vld [vmem:[%s2457_s0 + $0xf0] sm:$0xff]  ;;  %v24_v32 = vld [vmem:[%s2457_s0 + $0x68] sm:$0xff] }
   0xc   :  { %1561 = vmatprep.mubr.msk.f32.mxu0 %vm49_vm0, %v1807_v12  ;;  %1588 = vmatprep.mubr.msk.f32.mxu1 %vm49_vm0, %v1812_v13  ;;  %v1932_v33 = vld [vmem:[%s2457_s0 + $0xf8] sm:$0xff]  ;;  %v25_v34 = vld [vmem:[%s2457_s0 + $0x70] sm:$0xff]  ;;  %v1940_v35 = vld [vmem:[%s2457_s0 + $0x100] sm:$0xff] }
   0xd   :  { %1669 = vmatprep.subr.mxu0 %v1381_v14  ;;  %1611 = vmatprep.subr.mxu1 %v1343_v15  ;;  %v26_v36 = vld [vmem:[%s2457_s0 + $0x78] sm:$0xff]  ;;  %v1954_v37 = vld [vmem:[%s2457_s0 + $0x108] sm:$0xff]  ;;  %v27_v38 = vld [vmem:[%s2457_s0 + $0x80] sm:$0xff] }
   0xe   :  { %1670 = vmatpush3.msra.mxu0 %v1381_v14  ;;  %1612 = vmatpush3.msra.mxu1 %v1343_v15  ;;  %v1962_v39 = vld [vmem:[%s2457_s0 + $0x110] sm:$0xff]  ;;  %v28_v40 = vld [vmem:[%s2457_s0 + $0x88] sm:$0xff]  ;;  %v1976_v41 = vld [vmem:[%s2457_s0 + $0x118] sm:$0xff] }
   0xf   :  { %1562 = vmatmul.mubr.msk.f32.gmra.mxu0 %vm49_vm0, %v1835_v16  ;;  %1589 = vmatmul.mubr.msk.f32.gmra.mxu1 %vm49_vm0, %v1840_v17 }
  0x10   :  { %1564 = vmatprep.mubr.msk.f32.mxu0 %vm49_vm0, %v1845_v18  ;;  %1591 = vmatprep.mubr.msk.f32.mxu1 %vm49_vm0, %v1850_v19 }
  0x13   :  { %1565 = vmatmul.mubr.msk.f32.gmra.mxu0 %vm49_vm0, %v18_v20  ;;  %1592 = vmatmul.mubr.msk.f32.gmra.mxu1 %vm49_vm0, %v1866_v21 }
  0x14   :  { %1567 = vmatprep.mubr.msk.f32.mxu0 %vm49_vm0, %v19_v22  ;;  %1594 = vmatprep.mubr.msk.f32.mxu1 %vm49_vm0, %v1874_v23 }
  0x17   :  { %1568 = vmatmul.mubr.msk.f32.gmra.mxu0 %vm49_vm0, %v20_v24  ;;  %1595 = vmatmul.mubr.msk.f32.gmra.mxu1 %vm49_vm0, %v1888_v25 }
  0x18   :  { %1570 = vmatprep.mubr.msk.f32.mxu0 %vm49_vm0, %v21_v26  ;;  %1597 = vmatprep.mubr.msk.f32.mxu1 %vm49_vm0, %v1896_v27 }
  0x1b   :  { %1571 = vmatmul.mubr.msk.f32.gmra.mxu0 %vm49_vm0, %v22_v28  ;;  %1598 = vmatmul.mubr.msk.f32.gmra.mxu1 %vm49_vm0, %v1910_v29 }
  0x1c   :  { %1573 = vmatprep.mubr.msk.f32.mxu0 %vm49_vm0, %v23_v30  ;;  %1600 = vmatprep.mubr.msk.f32.mxu1 %vm49_vm0, %v1918_v31 }
  0x1f   :  { %1574 = vmatmul.mubr.msk.f32.gmra.mxu0 %vm49_vm0, %v24_v32  ;;  %1601 = vmatmul.mubr.msk.f32.gmra.mxu1 %vm49_vm0, %v1932_v33 }
  0x20   :  { %1576 = vmatprep.mubr.msk.f32.mxu0 %vm49_vm0, %v25_v34  ;;  %1603 = vmatprep.mubr.msk.f32.mxu1 %vm49_vm0, %v1940_v35 }
  0x23   :  { %1577 = vmatmul.mubr.msk.f32.gmra.mxu0 %vm49_vm0, %v26_v36  ;;  %1604 = vmatmul.mubr.msk.f32.gmra.mxu1 %vm49_vm0, %v1954_v37 }
  0x24   :  { %1579 = vmatprep.mubr.msk.f32.mxu0 %vm49_vm0, %v27_v38  ;;  %1606 = vmatprep.mubr.msk.f32.mxu1 %vm49_vm0, %v1962_v39 }
  0x27   :  { %1580 = vmatmul.mubr.msk.f32.gmra.mxu0 %vm49_vm0, %v28_v40  ;;  %1607 = vmatmul.mubr.msk.f32.gmra.mxu1 %vm49_vm0, %v1976_v41 }
  0x28   :  { %1613 = vmatprep.mubr.msk.f32.mxu1 %vm49_vm0, %v1753_v2  ;;  %1671 = vmatprep.mubr.msk.f32.mxu0 %vm49_vm0, %v1753_v2 }
  0x2b   :  { %1614 = vmatmul.mubr.msk.f32.vlgmr.msra.gmra.mxu1 %vm49_vm0, %v1763_v4  ;;  %1672 = vmatmul.mubr.msk.f32.vlgmr.msra.gmra.mxu0 %vm49_vm0, %v1763_v4 }
  0x2c   :  { %1616 = vmatprep.mubr.msk.f32.mxu1 %vm49_vm0, %v1787_v8  ;;  %1674 = vmatprep.mubr.msk.f32.mxu0 %vm49_vm0, %v1787_v8 }
  0x2f   :  { %1617 = vmatmul.mubr.msk.f32.gmra.mxu1 %vm49_vm0, %v1797_v10  ;;  %1675 = vmatmul.mubr.msk.f32.gmra.mxu0 %vm49_vm0, %v1797_v10 }
  0x30   :  { %1619 = vmatprep.mubr.msk.f32.mxu1 %vm49_vm0, %v1807_v12  ;;  %1677 = vmatprep.mubr.msk.f32.mxu0 %vm49_vm0, %v1807_v12 }
  0x33   :  { %1620 = vmatmul.mubr.msk.f32.gmra.mxu1 %vm49_vm0, %v1835_v16  ;;  %1678 = vmatmul.mubr.msk.f32.gmra.mxu0 %vm49_vm0, %v1835_v16 }
  0x34   :  { %1622 = vmatprep.mubr.msk.f32.mxu1 %vm49_vm0, %v1845_v18  ;;  %1680 = vmatprep.mubr.msk.f32.mxu0 %vm49_vm0, %v1845_v18 }
  0x37   :  { %1623 = vmatmul.mubr.msk.f32.gmra.mxu1 %vm49_vm0, %v18_v20  ;;  %1681 = vmatmul.mubr.msk.f32.gmra.mxu0 %vm49_vm0, %v18_v20 }
  0x38   :  { %1625 = vmatprep.mubr.msk.f32.mxu1 %vm49_vm0, %v19_v22  ;;  %1683 = vmatprep.mubr.msk.f32.mxu0 %vm49_vm0, %v19_v22 }
  0x3b   :  { %1626 = vmatmul.mubr.msk.f32.gmra.mxu1 %vm49_vm0, %v20_v24  ;;  %1684 = vmatmul.mubr.msk.f32.gmra.mxu0 %vm49_vm0, %v20_v24 }
  0x3c   :  { %1628 = vmatprep.mubr.msk.f32.mxu1 %vm49_vm0, %v21_v26  ;;  %1686 = vmatprep.mubr.msk.f32.mxu0 %vm49_vm0, %v21_v26 }
  0x3f   :  { %1629 = vmatmul.mubr.msk.f32.gmra.mxu1 %vm49_vm0, %v22_v28  ;;  %1687 = vmatmul.mubr.msk.f32.gmra.mxu0 %vm49_vm0, %v22_v28 }
  0x40   :  { %1631 = vmatprep.mubr.msk.f32.mxu1 %vm49_vm0, %v23_v30  ;;  %1689 = vmatprep.mubr.msk.f32.mxu0 %vm49_vm0, %v23_v30 }
  0x43   :  { %1632 = vmatmul.mubr.msk.f32.gmra.mxu1 %vm49_vm0, %v24_v32  ;;  %1690 = vmatmul.mubr.msk.f32.gmra.mxu0 %vm49_vm0, %v24_v32 }
  0x44   :  { %1634 = vmatprep.mubr.msk.f32.mxu1 %vm49_vm0, %v25_v34  ;;  %1692 = vmatprep.mubr.msk.f32.mxu0 %vm49_vm0, %v25_v34 }
  0x47   :  { %1635 = vmatmul.mubr.msk.f32.gmra.mxu1 %vm49_vm0, %v26_v36  ;;  %1693 = vmatmul.mubr.msk.f32.gmra.mxu0 %vm49_vm0, %v26_v36 }
  0x48   :  { %1637 = vmatprep.mubr.msk.f32.mxu1 %vm49_vm0, %v27_v38  ;;  %1695 = vmatprep.mubr.msk.f32.mxu0 %vm49_vm0, %v27_v38 }
  0x4b   :  { %1638 = vmatmul.mubr.msk.f32.gmra.mxu1 %vm49_vm0, %v28_v40  ;;  %1696 = vmatmul.mubr.msk.f32.gmra.mxu0 %vm49_vm0, %v28_v40 }
  0x4c   :  { %1640 = vmatprep.mubr.msk.f32.mxu1 %vm49_vm0, %v1758_v3  ;;  %1698 = vmatprep.mubr.msk.f32.mxu0 %vm49_vm0, %v1758_v3 }
  0x4f   :  { %1641 = vmatmul.mubr.msk.f32.gmra.mxu1 %vm49_vm0, %v1768_v5  ;;  %1699 = vmatmul.mubr.msk.f32.gmra.mxu0 %vm49_vm0, %v1768_v5 }
  0x50   :  { %1643 = vmatprep.mubr.msk.f32.mxu1 %vm49_vm0, %v1792_v9  ;;  %1701 = vmatprep.mubr.msk.f32.mxu0 %vm49_vm0, %v1792_v9 }
  0x53   :  { %1644 = vmatmul.mubr.msk.f32.gmra.mxu1 %vm49_vm0, %v1802_v11  ;;  %1702 = vmatmul.mubr.msk.f32.gmra.mxu0 %vm49_vm0, %v1802_v11 }
  0x54   :  { %1646 = vmatprep.mubr.msk.f32.mxu1 %vm49_vm0, %v1812_v13  ;;  %1704 = vmatprep.mubr.msk.f32.mxu0 %vm49_vm0, %v1812_v13 }
  0x57   :  { %1647 = vmatmul.mubr.msk.f32.gmra.mxu1 %vm49_vm0, %v1840_v17  ;;  %1705 = vmatmul.mubr.msk.f32.gmra.mxu0 %vm49_vm0, %v1840_v17 }
  0x58   :  { %1649 = vmatprep.mubr.msk.f32.mxu1 %vm49_vm0, %v1850_v19  ;;  %1707 = vmatprep.mubr.msk.f32.mxu0 %vm49_vm0, %v1850_v19 }
  0x5b   :  { %1650 = vmatmul.mubr.msk.f32.gmra.mxu1 %vm49_vm0, %v1866_v21  ;;  %1708 = vmatmul.mubr.msk.f32.gmra.mxu0 %vm49_vm0, %v1866_v21 }
  0x5c   :  { %1652 = vmatprep.mubr.msk.f32.mxu1 %vm49_vm0, %v1874_v23  ;;  %1710 = vmatprep.mubr.msk.f32.mxu0 %vm49_vm0, %v1874_v23 }
  0x5f   :  { %1653 = vmatmul.mubr.msk.f32.gmra.mxu1 %vm49_vm0, %v1888_v25  ;;  %1711 = vmatmul.mubr.msk.f32.gmra.mxu0 %vm49_vm0, %v1888_v25 }
  0x60   :  { %1655 = vmatprep.mubr.msk.f32.mxu1 %vm49_vm0, %v1896_v27  ;;  %1713 = vmatprep.mubr.msk.f32.mxu0 %vm49_vm0, %v1896_v27 }
  0x63   :  { %1656 = vmatmul.mubr.msk.f32.gmra.mxu1 %vm49_vm0, %v1910_v29  ;;  %1714 = vmatmul.mubr.msk.f32.gmra.mxu0 %vm49_vm0, %v1910_v29 }
  0x64   :  { %1658 = vmatprep.mubr.msk.f32.mxu1 %vm49_vm0, %v1918_v31  ;;  %1716 = vmatprep.mubr.msk.f32.mxu0 %vm49_vm0, %v1918_v31 }
  0x67   :  { %1659 = vmatmul.mubr.msk.f32.gmra.mxu1 %vm49_vm0, %v1932_v33  ;;  %1717 = vmatmul.mubr.msk.f32.gmra.mxu0 %vm49_vm0, %v1932_v33 }
  0x68   :  { %1661 = vmatprep.mubr.msk.f32.mxu1 %vm49_vm0, %v1940_v35  ;;  %1719 = vmatprep.mubr.msk.f32.mxu0 %vm49_vm0, %v1940_v35 }
  0x6b   :  { %1662 = vmatmul.mubr.msk.f32.gmra.mxu1 %vm49_vm0, %v1954_v37  ;;  %1720 = vmatmul.mubr.msk.f32.gmra.mxu0 %vm49_vm0, %v1954_v37 }
  0x6c   :  { %1664 = vmatprep.mubr.msk.f32.mxu1 %vm49_vm0, %v1962_v39  ;;  %1722 = vmatprep.mubr.msk.f32.mxu0 %vm49_vm0, %v1962_v39 }
  0x6f   :  { %1665 = vmatmul.mubr.msk.f32.gmra.mxu1 %vm49_vm0, %v1976_v41  ;;  %1723 = vmatmul.mubr.msk.f32.gmra.mxu0 %vm49_vm0, %v1976_v41 }
  0xc7   :  { %v2103_v42 = vpop.f32.mrf.mxu0  ;;  %v1584_v43 = vpop.f32.mrf.mxu1 }
  0xc8   :  { %v1123_v44 = vrot.slane %v1584_v43, 7 }
  0xc9   :  { %v2105_v45 = vpop.f32.mrf.mxu0  ;;  %v2107_v46 = vpop.f32.mrf.mxu1 }
  0xca   :  { %v1122_v47 = vrot.slane %v2107_v46, 7 }
  0xcb   :  { %v2110_v48 = vpop.f32.mrf.mxu0  ;;  %v1587_v49 = vpop.f32.mrf.mxu1 }
  0xcc   :  { %v2115_v50 = vsel %vm919_vm1, %v1122_v47, %v1123_v44  ;;  %v1127_v51 = vrot.slane %v1587_v49, 7 }
  0xcd   :  { %v2117_v52 = vpop.f32.mrf.mxu0  ;;  %v324_v53 = vpop.f32.mrf.mxu1 }
  0xce   :  { %v1125_v54 = vrot.slane %v324_v53, 7 }
  0xcf   :  { %v2119_v55 = vpop.f32.mrf.mxu0  ;;  %v1590_v56 = vpop.f32.mrf.mxu1 }
  0xd0   :  { %v1131_v57 = vrot.slane %v1590_v56, 7  ;;  %v2124_v60 = vsel %vm919_vm1, %v1125_v54, %v1127_v51  ;;  %v2127_v61 = vsel %vm919_vm1, %v1123_v44, %v1125_v54  ;;  %v920_v54 = vrot.slane %v2105_v45, 7 }
  0xd1   :  { %v2121_v58 = vpop.f32.mrf.mxu0  ;;  %v334_v59 = vpop.f32.mrf.mxu1 }
  0xd2   :  { %v1129_v62 = vrot.slane %v334_v59, 7 }
  0xd3   :  { %v2129_v63 = vpop.f32.mrf.mxu0  ;;  %v1593_v0 = vpop.f32.mrf.mxu1 }
  0xd4   :  { %v1135_v1 = vrot.slane %v1593_v0, 7  ;;  %v2134_v4 = vsel %vm919_vm1, %v1129_v62, %v1131_v57  ;;  %v2137_v5 = vsel %vm919_vm1, %v1127_v51, %v1129_v62  ;;  %v923_v62 = vrot.slane %v2117_v52, 7 }
  0xd5   :  { %v2131_v2 = vpop.f32.mrf.mxu0  ;;  %v344_v3 = vpop.f32.mrf.mxu1  ;;  %v921_v52 = vrot.slane %v2103_v42, 7  ;;  %v925_v42 = vrot.slane %v2110_v48, 7 }
  0xd6   :  { %v1133_v6 = vrot.slane %v344_v3, 7 }
  0xd7   :  { %v2139_v7 = vpop.f32.mrf.mxu0  ;;  %v1596_v8 = vpop.f32.mrf.mxu1 }
  0xd8   :  { %v1139_v9 = vrot.slane %v1596_v8, 7  ;;  %v2144_v12 = vsel %vm919_vm1, %v1133_v6, %v1135_v1  ;;  %v2147_v13 = vsel %vm919_vm1, %v1131_v57, %v1133_v6 }
  0xd9   :  { %v2141_v10 = vpop.f32.mrf.mxu0  ;;  %v354_v11 = vpop.f32.mrf.mxu1 }
  0xda   :  { %v1137_v14 = vrot.slane %v354_v11, 7 }
  0xdb   :  { %v2149_v15 = vpop.f32.mrf.mxu0  ;;  %v1599_v16 = vpop.f32.mrf.mxu1 }
  0xdc   :  { %v1143_v17 = vrot.slane %v1599_v16, 7  ;;  %v2154_v20 = vsel %vm919_vm1, %v1137_v14, %v1139_v9  ;;  %v2157_v21 = vsel %vm919_vm1, %v1135_v1, %v1137_v14 }
  0xdd   :  { %v2151_v18 = vpop.f32.mrf.mxu0  ;;  %v364_v19 = vpop.f32.mrf.mxu1 }
  0xde   :  { %v1141_v22 = vrot.slane %v364_v19, 7  ;;  %v927_v19 = vrot.slane %v2121_v58, 7 }
  0xdf   :  { %v2159_v23 = vpop.f32.mrf.mxu0  ;;  %v1602_v24 = vpop.f32.mrf.mxu1 }
  0xe0   :  { %v1147_v25 = vrot.slane %v1602_v24, 7  ;;  %v2164_v28 = vsel %vm919_vm1, %v1141_v22, %v1143_v17  ;;  %v2167_v29 = vsel %vm919_vm1, %v1139_v9, %v1141_v22 }
  0xe1   :  { %v2161_v26 = vpop.f32.mrf.mxu0  ;;  %v374_v27 = vpop.f32.mrf.mxu1 }
  0xe2   :  { %v1145_v30 = vrot.slane %v374_v27, 7 }
  0xe3   :  { %v2169_v31 = vpop.f32.mrf.mxu0  ;;  %v1605_v32 = vpop.f32.mrf.mxu1 }
  0xe4   :  { %v1151_v33 = vrot.slane %v1605_v32, 7  ;;  %v2174_v36 = vsel %vm919_vm1, %v1145_v30, %v1147_v25  ;;  %v2177_v37 = vsel %vm919_vm1, %v1143_v17, %v1145_v30  ;;  %v922_v30 = vsel %vm919_vm1, %v920_v54, %v921_v52 }
  0xe5   :  { %v2171_v34 = vpop.f32.mrf.mxu0  ;;  %v384_v35 = vpop.f32.mrf.mxu1 }
  0xe6   :  { %v1149_v38 = vrot.slane %v384_v35, 7 }
  0xe7   :  { %v2179_v39 = vpop.f32.mrf.mxu0  ;;  %v2181_v40 = vpop.f32.mrf.mxu1 }
  0xe8   :  { %v900_v41 = vrot.slane %v2179_v39, 7  ;;  %v2187_v49 = vsel %vm919_vm1, %v1149_v38, %v1151_v33  ;;  %v2190_v51 = vsel %vm919_vm1, %v1147_v25, %v1149_v38  ;;  %v1103_v56 = vrot.slane %v2181_v40, 7 }
  0xe9   :  { %v2184_v43 = vpop.f32.mrf.mxu0  ;;  %v394_v44 = vpop.f32.mrf.mxu1  ;;  %v924_v25 = vsel %vm919_vm1, %v921_v52, %v923_v62  ;;  %v928_v52 = vsel %vm919_vm1, %v925_v42, %v927_v19 }
  0xea   :  { %v1153_v53 = vrot.slane %v394_v44, 7  ;;  %v972_v1 = vsel %vm919_vm1, %v900_v41, %v920_v54 }
  0xeb   :  { %v1615_v57 = vpop.f32.mrf.mxu1  ;;  %v1673_v59 = vpop.f32.mrf.mxu0 }
  0xec   :  { %v2203_v6 = vsel %vm919_vm1, %v1153_v53, %v1103_v56  ;;  %v2206_v45 = vsel %vm919_vm1, %v1151_v33, %v1153_v53  ;;  %v1011_v8 = vrot.slane %v1673_v59, 1  ;;  %v974_v38 = vadd.f32 %v1615_v57, %v922_v30 }
  0xed   :  { %v472_v0 = vpop.f32.mrf.mxu1  ;;  %v2198_v3 = vpop.f32.mrf.mxu0  ;;  %v926_v57 = vsel %vm919_vm1, %v923_v62, %v925_v42  ;;  %v935_v30 = vrot.slane %v2141_v10, 7 }
  0xee   :  { %v973_v9 = vadd.f32 %v972_v1, %v472_v0  ;;  %v1010_v11 = vrot.slane %v2198_v3, 1  ;;  %v931_v0 = vrot.slane %v2131_v2, 7 }
  0xef   :  { %v1618_v14 = vpop.f32.mrf.mxu1  ;;  %v1676_v16 = vpop.f32.mrf.mxu0 }
  0xf0   :  { %v1012_v17 = vsel %vm1009_vm2, %v1010_v11, %v1011_v8  ;;  %v1015_v32 = vrot.slane %v1676_v16, 1 }
  0xf1   :  { %v1065_v22 = vadd.f32 %v1012_v17, %v973_v9  ;;  %v482_v24 = vpop.f32.mrf.mxu1  ;;  %v730_v27 = vpop.f32.mrf.mxu0 }
  0xf2   :  { %v975_v33 = vadd.f32 %v924_v25, %v482_v24  ;;  %v1013_v35 = vrot.slane %v730_v27, 1  ;;  %v976_v25 = vadd.f32 %v1618_v14, %v926_v57 }
  0xf3   :  { %1084 = vst.msk [vmem:[%s2458_s2] sm:$0xff] %vm1083_vm3, %v1065_v22  ;;  %v1621_v44 = vpop.f32.mrf.mxu1  ;;  %v1679_v58 = vpop.f32.mrf.mxu0  ;;  %v929_v22 = vrot.slane %v2119_v55, 7 }
  0xf4   :  { %v1014_v53 = vsel %vm1009_vm2, %v1011_v8, %v1013_v35  ;;  %v1016_v59 = vsel %vm1009_vm2, %v1013_v35, %v1015_v32  ;;  %v1019_v16 = vrot.slane %v1679_v58, 1 }
  0xf5   :  { %v1066_v54 = vadd.f32 %v1014_v53, %v974_v38  ;;  %v1067_v1 = vadd.f32 %v1016_v59, %v975_v33  ;;  %v492_v9 = vpop.f32.mrf.mxu1  ;;  %v740_v48 = vpop.f32.mrf.mxu0  ;;  %v932_v35 = vsel %vm919_vm1, %v929_v22, %v931_v0  ;;  %v930_v38 = vsel %vm919_vm1, %v927_v19, %v929_v22 }
  0xf6   :  { %v977_v17 = vadd.f32 %v928_v52, %v492_v9  ;;  %v1017_v24 = vrot.slane %v740_v48, 1  ;;  %v939_v52 = vrot.slane %v2151_v18, 7 }
  0xf7   :  { %1085 = vst.msk [vmem:[%s2458_s2 + $0x8] sm:$0xff] %vm1083_vm3, %v1066_v54  ;;  %1086 = vst.msk [vmem:[%s2458_s2 + $0x10] sm:$0xff] %vm1083_vm3, %v1067_v1  ;;  %v1624_v2 = vpop.f32.mrf.mxu1  ;;  %v1682_v8 = vpop.f32.mrf.mxu0  ;;  %v933_v54 = vrot.slane %v2129_v63, 7  ;;  %v978_v1 = vadd.f32 %v1621_v44, %v930_v38 }
  0xf8   :  { %v1018_v62 = vsel %vm1009_vm2, %v1015_v32, %v1017_v24  ;;  %v1020_v27 = vsel %vm1009_vm2, %v1017_v24, %v1019_v16  ;;  %v1023_v58 = vrot.slane %v1682_v8, 1 }
  0xf9   :  { %v1068_v55 = vadd.f32 %v1018_v62, %v976_v25  ;;  %v1069_v14 = vadd.f32 %v1020_v27, %v977_v17  ;;  %v502_v33 = vpop.f32.mrf.mxu1  ;;  %v750_v42 = vpop.f32.mrf.mxu0  ;;  %v936_v57 = vsel %vm919_vm1, %v933_v54, %v935_v30  ;;  %v934_v24 = vsel %vm919_vm1, %v931_v0, %v933_v54 }
  0xfa   :  { %v979_v53 = vadd.f32 %v932_v35, %v502_v33  ;;  %v1021_v59 = vrot.slane %v750_v42, 1  ;;  %v937_v62 = vrot.slane %v2139_v7, 7  ;;  %v980_v27 = vadd.f32 %v1624_v2, %v934_v24 }
  0xfb   :  { %1087 = vst.msk [vmem:[%s2458_s2 + $0x18] sm:$0xff] %vm1083_vm3, %v1068_v55  ;;  %1088 = vst.msk [vmem:[%s2458_s2 + $0x20] sm:$0xff] %vm1083_vm3, %v1069_v14  ;;  %v1627_v10 = vpop.f32.mrf.mxu1  ;;  %v1685_v32 = vpop.f32.mrf.mxu0  ;;  %v943_v14 = vrot.slane %v2161_v26, 7 }
  0xfc   :  { %v1022_v19 = vsel %vm1009_vm2, %v1019_v16, %v1021_v59  ;;  %v1024_v9 = vsel %vm1009_vm2, %v1021_v59, %v1023_v58  ;;  %v1027_v22 = vrot.slane %v1685_v32, 1  ;;  %v940_v35 = vsel %vm919_vm1, %v937_v62, %v939_v52 }
  0xfd   :  { %v1070_v63 = vadd.f32 %v1022_v19, %v978_v1  ;;  %v1071_v44 = vadd.f32 %v1024_v9, %v979_v53  ;;  %v512_v48 = vpop.f32.mrf.mxu1  ;;  %v760_v17 = vpop.f32.mrf.mxu0  ;;  %v938_v38 = vsel %vm919_vm1, %v935_v30, %v937_v62  ;;  %v941_v1 = vrot.slane %v2149_v15, 7 }
  0xfe   :  { %v981_v25 = vadd.f32 %v936_v57, %v512_v48  ;;  %v1025_v8 = vrot.slane %v760_v17, 1  ;;  %v982_v32 = vadd.f32 %v1627_v10, %v938_v38  ;;  %v947_v9 = vrot.slane %v2171_v34, 7 }
  0xff   :  { %1089 = vst.msk [vmem:[%s2458_s2 + $0x28] sm:$0xff] %vm1083_vm3, %v1070_v63  ;;  %1090 = vst.msk [vmem:[%s2458_s2 + $0x30] sm:$0xff] %vm1083_vm3, %v1071_v44  ;;  %v1630_v18 = vpop.f32.mrf.mxu1  ;;  %v1688_v16 = vpop.f32.mrf.mxu0  ;;  %v944_v44 = vsel %vm919_vm1, %v941_v1, %v943_v14  ;;  %v942_v57 = vsel %vm919_vm1, %v939_v52, %v941_v1  ;;  %v951_v62 = vrot.slane %v2184_v43, 7 }
 0x100   :  { %v1026_v0 = vsel %vm1009_vm2, %v1023_v58, %v1025_v8  ;;  %v1028_v55 = vsel %vm1009_vm2, %v1025_v8, %v1027_v22  ;;  %v1031_v53 = vrot.slane %v1688_v16, 1  ;;  %v945_v8 = vrot.slane %v2159_v23, 7 }
 0x101   :  { %v1072_v7 = vadd.f32 %v1026_v0, %v980_v27  ;;  %v1073_v2 = vadd.f32 %v1028_v55, %v981_v25  ;;  %v522_v33 = vpop.f32.mrf.mxu1  ;;  %v770_v42 = vpop.f32.mrf.mxu0 }
 0x102   :  { %v983_v59 = vadd.f32 %v940_v35, %v522_v33  ;;  %v1029_v54 = vrot.slane %v770_v42, 1  ;;  %v949_v42 = vrot.slane %v2169_v31, 7 }
 0x103   :  { %1091 = vst.msk [vmem:[%s2458_s2 + $0x38] sm:$0xff] %vm1083_vm3, %v1072_v7  ;;  %1092 = vst.msk [vmem:[%s2458_s2 + $0x40] sm:$0xff] %vm1083_vm3, %v1073_v2  ;;  %v1633_v26 = vpop.f32.mrf.mxu1  ;;  %v1691_v58 = vpop.f32.mrf.mxu0  ;;  %v946_v7 = vsel %vm919_vm1, %v943_v14, %v945_v8  ;;  %v953_v14 = vsel %vm919_vm1, %v951_v62, %v900_v41 }
 0x104   :  { %v1030_v30 = vsel %vm1009_vm2, %v1027_v22, %v1029_v54  ;;  %v1032_v19 = vsel %vm1009_vm2, %v1029_v54, %v1031_v53  ;;  %v1035_v17 = vrot.slane %v1691_v58, 1  ;;  %v984_v22 = vadd.f32 %v1630_v18, %v942_v57 }
 0x105   :  { %v1074_v15 = vadd.f32 %v1030_v30, %v982_v32  ;;  %v1075_v10 = vadd.f32 %v1032_v19, %v983_v59  ;;  %v532_v63 = vpop.f32.mrf.mxu1  ;;  %v780_v48 = vpop.f32.mrf.mxu0  ;;  %v948_v18 = vsel %vm919_vm1, %v945_v8, %v947_v9  ;;  %v986_v38 = vadd.f32 %v1633_v26, %v946_v7 }
 0x106   :  { %v985_v24 = vadd.f32 %v944_v44, %v532_v63  ;;  %v1033_v25 = vrot.slane %v780_v48, 1  ;;  %v952_v19 = vsel %vm919_vm1, %v949_v42, %v951_v62  ;;  %v1174_v8 = vsel %vm919_vm1, %v1103_v56, %v1122_v47 }
 0x107   :  { %1093 = vst.msk [vmem:[%s2458_s2 + $0x48] sm:$0xff] %vm1083_vm3, %v1074_v15  ;;  %1094 = vst.msk [vmem:[%s2458_s2 + $0x50] sm:$0xff] %vm1083_vm3, %v1075_v10  ;;  %v1636_v34 = vpop.f32.mrf.mxu1  ;;  %v1694_v52 = vpop.f32.mrf.mxu0  ;;  %v950_v10 = vsel %vm919_vm1, %v947_v9, %v949_v42 }
 0x108   :  { %v1034_v27 = vsel %vm1009_vm2, %v1031_v53, %v1033_v25  ;;  %v1036_v16 = vsel %vm1009_vm2, %v1033_v25, %v1035_v17  ;;  %v1039_v2 = vrot.slane %v1694_v52, 1  ;;  %v988_v44 = vadd.f32 %v1636_v34, %v950_v10 }
 0x109   :  { %v1076_v23 = vadd.f32 %v1034_v27, %v984_v22  ;;  %v1077_v0 = vadd.f32 %v1036_v16, %v985_v24  ;;  %v542_v43 = vpop.f32.mrf.mxu1  ;;  %v790_v55 = vpop.f32.mrf.mxu0 }
 0x10a   :  { %v987_v33 = vadd.f32 %v948_v18, %v542_v43  ;;  %v1037_v35 = vrot.slane %v790_v55, 1 }
 0x10b   :  { %1095 = vst.msk [vmem:[%s2458_s2 + $0x58] sm:$0xff] %vm1083_vm3, %v1076_v23  ;;  %1096 = vst.msk [vmem:[%s2458_s2 + $0x60] sm:$0xff] %vm1083_vm3, %v1077_v0  ;;  %v1639_v53 = vpop.f32.mrf.mxu1  ;;  %v1697_v59 = vpop.f32.mrf.mxu0 }
 0x10c   :  { %v1038_v54 = vsel %vm1009_vm2, %v1035_v17, %v1037_v35  ;;  %v1040_v31 = vsel %vm1009_vm2, %v1037_v35, %v1039_v2  ;;  %v990_v1 = vadd.f32 %v1639_v53, %v953_v14  ;;  %v1043_v32 = vrot.slane %v1697_v59, 1 }
 0x10d   :  { %v1078_v26 = vadd.f32 %v1038_v54, %v986_v38  ;;  %v1079_v58 = vadd.f32 %v1040_v31, %v987_v33  ;;  %v552_v30 = vpop.f32.mrf.mxu1  ;;  %v800_v15 = vpop.f32.mrf.mxu0 }
 0x10e   :  { %v1064_v39 = vsel %vm1009_vm2, %v1043_v32, %v1010_v11  ;;  %v989_v41 = vadd.f32 %v952_v19, %v552_v30  ;;  %v1041_v63 = vrot.slane %v800_v15, 1 }
 0x10f   :  { %1097 = vst.msk [vmem:[%s2458_s2 + $0x68] sm:$0xff] %vm1083_vm3, %v1078_v26  ;;  %1098 = vst.msk [vmem:[%s2458_s2 + $0x70] sm:$0xff] %vm1083_vm3, %v1079_v58  ;;  %v1082_v48 = vadd.f32 %v1064_v39, %v990_v1  ;;  %v1642_v57 = vpop.f32.mrf.mxu1  ;;  %v1700_v9 = vpop.f32.mrf.mxu0 }
 0x110   :  { %v1042_v3 = vsel %vm1009_vm2, %v1039_v2, %v1041_v63  ;;  %v1044_v11 = vsel %vm1009_vm2, %v1041_v63, %v1043_v32  ;;  %v1212_v22 = vrot.slane %v1700_v9, 1  ;;  %v1176_v18 = vadd.f32 %v1642_v57, %v2115_v50 }
 0x111   :  { %1101 = vst.msk [vmem:[%s2458_s2 + $0x88] sm:$0xff] %vm1083_vm3, %v1082_v48  ;;  %v1080_v17 = vadd.f32 %v1042_v3, %v988_v44  ;;  %v1081_v24 = vadd.f32 %v1044_v11, %v989_v41  ;;  %v562_v25 = vpop.f32.mrf.mxu1  ;;  %v2334_v62 = vpop.f32.mrf.mxu0 }
 0x112   :  { %v1175_v34 = vadd.f32 %v1174_v8, %v562_v25  ;;  %v1211_v52 = vrot.slane %v2334_v62, 1 }
 0x113   :  { %1099 = vst.msk [vmem:[%s2458_s2 + $0x78] sm:$0xff] %vm1083_vm3, %v1080_v17  ;;  %1100 = vst.msk [vmem:[%s2458_s2 + $0x80] sm:$0xff] %vm1083_vm3, %v1081_v24  ;;  %v1645_v46 = vpop.f32.mrf.mxu1  ;;  %v1703_v40 = vpop.f32.mrf.mxu0 }
 0x114   :  { %v1213_v47 = vsel %vm1009_vm2, %v1211_v52, %v1212_v22  ;;  %v1216_v23 = vrot.slane %v1703_v40, 1  ;;  %v1178_v50 = vadd.f32 %v1645_v46, %v2124_v60 }
 0x115   :  { %v1266_v56 = vadd.f32 %v1213_v47, %v1175_v34  ;;  %v572_v27 = vpop.f32.mrf.mxu1  ;;  %v820_v16 = vpop.f32.mrf.mxu0 }
 0x116   :  { %v1177_v0 = vadd.f32 %v2127_v61, %v572_v27  ;;  %v1214_v43 = vrot.slane %v820_v16, 1 }
 0x117   :  { %1419 = vst.msk [vmem:[%s2458_s2 + $0x90] sm:$0xff] %vm1083_vm3, %v1266_v56  ;;  %v1648_v55 = vpop.f32.mrf.mxu1  ;;  %v1706_v7 = vpop.f32.mrf.mxu0 }
 0x118   :  { %v1215_v2 = vsel %vm1009_vm2, %v1212_v22, %v1214_v43  ;;  %v1217_v33 = vsel %vm1009_vm2, %v1214_v43, %v1216_v23  ;;  %v1220_v14 = vrot.slane %v1706_v7, 1  ;;  %v1180_v10 = vadd.f32 %v1648_v55, %v2134_v4 }
 0x119   :  { %v1267_v35 = vadd.f32 %v1215_v2, %v1176_v18  ;;  %v1268_v42 = vadd.f32 %v1217_v33, %v1177_v0  ;;  %v582_v38 = vpop.f32.mrf.mxu1  ;;  %v830_v53 = vpop.f32.mrf.mxu0 }
 0x11a   :  { %v1179_v61 = vadd.f32 %v2137_v5, %v582_v38  ;;  %v1218_v59 = vrot.slane %v830_v53, 1 }
 0x11b   :  { %1420 = vst.msk [vmem:[%s2458_s2 + $0x98] sm:$0xff] %vm1083_vm3, %v1267_v35  ;;  %1421 = vst.msk [vmem:[%s2458_s2 + $0xa0] sm:$0xff] %vm1083_vm3, %v1268_v42  ;;  %v1651_v54 = vpop.f32.mrf.mxu1  ;;  %v1709_v31 = vpop.f32.mrf.mxu0 }
 0x11c   :  { %v1219_v1 = vsel %vm1009_vm2, %v1216_v23, %v1218_v59  ;;  %v1221_v32 = vsel %vm1009_vm2, %v1218_v59, %v1220_v14  ;;  %v1224_v30 = vrot.slane %v1709_v31, 1  ;;  %v1182_v17 = vadd.f32 %v1651_v54, %v2144_v12 }
 0x11d   :  { %v1269_v5 = vadd.f32 %v1219_v1, %v1178_v50  ;;  %v1270_v26 = vadd.f32 %v1221_v32, %v1179_v61  ;;  %v592_v58 = vpop.f32.mrf.mxu1  ;;  %v840_v60 = vpop.f32.mrf.mxu0 }
 0x11e   :  { %v1181_v19 = vadd.f32 %v2147_v13, %v592_v58  ;;  %v1222_v15 = vrot.slane %v840_v60, 1 }
 0x11f   :  { %1422 = vst.msk [vmem:[%s2458_s2 + $0xa8] sm:$0xff] %vm1083_vm3, %v1269_v5  ;;  %1423 = vst.msk [vmem:[%s2458_s2 + $0xb0] sm:$0xff] %vm1083_vm3, %v1270_v26  ;;  %v1654_v39 = vpop.f32.mrf.mxu1  ;;  %v1712_v41 = vpop.f32.mrf.mxu0 }
 0x120   :  { %v1223_v63 = vsel %vm1009_vm2, %v1220_v14, %v1222_v15  ;;  %v1225_v44 = vsel %vm1009_vm2, %v1222_v15, %v1224_v30  ;;  %v1228_v9 = vrot.slane %v1712_v41, 1  ;;  %v1184_v27 = vadd.f32 %v1654_v39, %v2154_v20 }
 0x121   :  { %v1271_v13 = vadd.f32 %v1223_v63, %v1180_v10  ;;  %v1272_v48 = vadd.f32 %v1225_v44, %v1181_v19  ;;  %v602_v57 = vpop.f32.mrf.mxu1  ;;  %v850_v4 = vpop.f32.mrf.mxu0 }
 0x122   :  { %v1183_v3 = vadd.f32 %v2157_v21, %v602_v57  ;;  %v1226_v11 = vrot.slane %v850_v4, 1 }
 0x123   :  { %1424 = vst.msk [vmem:[%s2458_s2 + $0xb8] sm:$0xff] %vm1083_vm3, %v1271_v13  ;;  %1425 = vst.msk [vmem:[%s2458_s2 + $0xc0] sm:$0xff] %vm1083_vm3, %v1272_v48  ;;  %v1657_v24 = vpop.f32.mrf.mxu1  ;;  %v1715_v25 = vpop.f32.mrf.mxu0 }
 0x124   :  { %v1227_v8 = vsel %vm1009_vm2, %v1224_v30, %v1226_v11  ;;  %v1229_v22 = vsel %vm1009_vm2, %v1226_v11, %v1228_v9  ;;  %v1232_v40 = vrot.slane %v1715_v25, 1  ;;  %v1186_v35 = vadd.f32 %v1657_v24, %v2164_v28 }
 0x125   :  { %v1273_v21 = vadd.f32 %v1227_v8, %v1182_v17  ;;  %v1274_v34 = vadd.f32 %v1229_v22, %v1183_v3  ;;  %v612_v46 = vpop.f32.mrf.mxu1  ;;  %v860_v12 = vpop.f32.mrf.mxu0 }
 0x126   :  { %v1185_v47 = vadd.f32 %v2167_v29, %v612_v46  ;;  %v1230_v56 = vrot.slane %v860_v12, 1 }
 0x127   :  { %1426 = vst.msk [vmem:[%s2458_s2 + $0xc8] sm:$0xff] %vm1083_vm3, %v1273_v21  ;;  %1427 = vst.msk [vmem:[%s2458_s2 + $0xd0] sm:$0xff] %vm1083_vm3, %v1274_v34  ;;  %v1660_v16 = vpop.f32.mrf.mxu1  ;;  %v1718_v23 = vpop.f32.mrf.mxu0 }
 0x128   :  { %v1231_v0 = vsel %vm1009_vm2, %v1228_v9, %v1230_v56  ;;  %v1233_v43 = vsel %vm1009_vm2, %v1230_v56, %v1232_v40  ;;  %v1236_v7 = vrot.slane %v1718_v23, 1  ;;  %v1188_v1 = vadd.f32 %v1660_v16, %v2174_v36 }
 0x129   :  { %v1275_v29 = vadd.f32 %v1231_v0, %v1184_v27  ;;  %v1276_v18 = vadd.f32 %v1233_v43, %v1185_v47  ;;  %v622_v55 = vpop.f32.mrf.mxu1  ;;  %v870_v20 = vpop.f32.mrf.mxu0 }
 0x12a   :  { %v1187_v2 = vadd.f32 %v2177_v37, %v622_v55  ;;  %v1234_v33 = vrot.slane %v870_v20, 1 }
 0x12b   :  { %1428 = vst.msk [vmem:[%s2458_s2 + $0xd8] sm:$0xff] %vm1083_vm3, %v1275_v29  ;;  %1429 = vst.msk [vmem:[%s2458_s2 + $0xe0] sm:$0xff] %vm1083_vm3, %v1276_v18  ;;  %v1663_v42 = vpop.f32.mrf.mxu1  ;;  %v1721_v38 = vpop.f32.mrf.mxu0 }
 0x12c   :  { %v1235_v53 = vsel %vm1009_vm2, %v1232_v40, %v1234_v33  ;;  %v1237_v14 = vsel %vm1009_vm2, %v1234_v33, %v1236_v7  ;;  %v1240_v50 = vrot.slane %v1721_v38, 1  ;;  %v1190_v63 = vadd.f32 %v1663_v42, %v2187_v49 }
 0x12d   :  { %v1277_v37 = vadd.f32 %v1235_v53, %v1186_v35  ;;  %v1278_v61 = vadd.f32 %v1237_v14, %v1187_v2  ;;  %v632_v59 = vpop.f32.mrf.mxu1  ;;  %v880_v28 = vpop.f32.mrf.mxu0 }
 0x12e   :  { %v1189_v54 = vadd.f32 %v2190_v51, %v632_v59  ;;  %v1238_v31 = vrot.slane %v880_v28, 1 }
 0x12f   :  { %1430 = vst.msk [vmem:[%s2458_s2 + $0xe8] sm:$0xff] %vm1083_vm3, %v1277_v37  ;;  %1431 = vst.msk [vmem:[%s2458_s2 + $0xf0] sm:$0xff] %vm1083_vm3, %v1278_v61  ;;  %v1666_v32 = vpop.f32.mrf.mxu1  ;;  %v1724_v5 = vpop.f32.mrf.mxu0 }
 0x130   :  { %v1239_v26 = vsel %vm1009_vm2, %v1236_v7, %v1238_v31  ;;  %v1241_v58 = vsel %vm1009_vm2, %v1238_v31, %v1240_v50  ;;  %v1192_v51 = vadd.f32 %v1666_v32, %v2203_v6  ;;  %v1244_v60 = vrot.slane %v1724_v5, 1 }
 0x131   :  { %v1279_v36 = vadd.f32 %v1239_v26, %v1188_v1  ;;  %v1280_v30 = vadd.f32 %v1241_v58, %v1189_v54  ;;  %v642_v19 = vpop.f32.mrf.mxu1  ;;  %v890_v15 = vpop.f32.mrf.mxu0 }
 0x132   :  { %v1265_v10 = vsel %vm1009_vm2, %v1244_v60, %v1211_v52  ;;  %v1191_v39 = vadd.f32 %v2206_v45, %v642_v19  ;;  %v1242_v41 = vrot.slane %v890_v15, 1 }
 0x133   :  { %1432 = vst.msk [vmem:[%s2458_s2 + $0xf8] sm:$0xff] %vm1083_vm3, %v1279_v36  ;;  %1433 = vst.msk [vmem:[%s2458_s2 + $0x100] sm:$0xff] %vm1083_vm3, %v1280_v30  ;;  %v1283_v6 = vadd.f32 %v1265_v10, %v1192_v51 }
 0x134   :  { %v1243_v62 = vsel %vm1009_vm2, %v1240_v50, %v1242_v41  ;;  %v1245_v52 = vsel %vm1009_vm2, %v1242_v41, %v1244_v60 }
 0x135   :  { %1436 = vst.msk [vmem:[%s2458_s2 + $0x118] sm:$0xff] %vm1083_vm3, %v1283_v6  ;;  %v1281_v49 = vadd.f32 %v1243_v62, %v1190_v63  ;;  %v1282_v45 = vadd.f32 %v1245_v52, %v1191_v39 }
 0x137   :  { %1434 = vst.msk [vmem:[%s2458_s2 + $0x108] sm:$0xff] %vm1083_vm3, %v1281_v49  ;;  %1435 = vst.msk [vmem:[%s2458_s2 + $0x110] sm:$0xff] %vm1083_vm3, %v1282_v45 }

</bundles_post_ra>
